<compile_context>
chip_gen: v6e
topology: v6e:2x2x1
jax: 0.10.0
libtpu: 0.0.40
codegen_flags: <defaults>
</compile_context>

<pallas_src>
import functools
import math

import jax
import jax.numpy as jnp
from jax.experimental import pallas as pl
from jax.experimental.pallas import tpu as pltpu


def _mha_kernel(q_ref, k_ref, v_ref,
                wq_ref, bq_ref, wk_ref, bk_ref, wv_ref, bv_ref,
                wo_ref, bo_ref,
                out_ref, sc_ref,
                acc_ref,
                *, compute_dtype):
    """One grid step = (batch b, q-tile i, head h); h innermost reduction."""
    h = pl.program_id(2)

    @pl.when(h == 0)
    def _init():
        acc_ref[...] = jnp.zeros_like(acc_ref)

    f32 = jnp.float32

    q = q_ref[0]                      # (block_q, d_model) — input dtype, no up-cast
    k = k_ref[0]                      # (seq_k,  d_model)
    v = v_ref[0]

    # Per-head projections: MXU matmuls with f32 accumulation, operands stay in
    # the (possibly bf16) compute dtype.  1/sqrt(d_k) already folded into wq/bq.
    qh = (jnp.dot(q, wq_ref[0], preferred_element_type=f32) + bq_ref[0]).astype(compute_dtype)
    kh = (jnp.dot(k, wk_ref[0], preferred_element_type=f32) + bk_ref[0]).astype(compute_dtype)
    vh = (jnp.dot(v, wv_ref[0], preferred_element_type=f32) + bv_ref[0]).astype(compute_dtype)

    # scores[q, k] = qh . kh  (contract d_k of both operands — no kh.T materialized)
    s = jax.lax.dot_general(qh, kh, (((1,), (1,)), ((), ())),
                            preferred_element_type=f32)        # (block_q, seq_k) f32

    # Numerically-stable softmax in f32; divide -> EUP reciprocal (frees VALU slots).
    m = jnp.max(s, axis=-1, keepdims=True)
    e = jnp.exp(s - m)
    denom = jnp.sum(e, axis=-1, keepdims=True)
    p = e * pl.reciprocal(denom, approx=True)                  # (block_q, seq_k)

    sc_ref[0, 0] = p.astype(sc_ref.dtype)

    # Weighted values, then this head's slice of the output projection.
    o_h = jnp.dot(p.astype(compute_dtype), vh, preferred_element_type=f32)   # (block_q, d_k)
    acc_ref[...] += jnp.dot(o_h.astype(compute_dtype), wo_ref[0],
                            preferred_element_type=f32)                      # (block_q, d_model)

    @pl.when(h == pl.num_programs(2) - 1)
    def _finalize():
        out_ref[0] = (acc_ref[...] + bo_ref[...]).astype(out_ref.dtype)


def multi_head_attention(q, k, v, params, heads, *,
                         block_q=None, scores_dtype=jnp.float32):
    """Pallas forward of MultiHeadAttention (eval mode, mask=None).

    params follow PyTorch nn.Linear convention: w* are (out, in), b* are (out,).
    Returns (output, attention_scores) like the PyTorch module.
    Set scores_dtype=jnp.bfloat16 to halve the O(bs*heads*seq^2) HBM writeback."""
    bs, seq_q, d_model = q.shape
    seq_k = k.shape[1]
    assert v.shape[1] == seq_k
    d_k = d_model // heads
    compute_dtype = q.dtype

    if block_q is None:
        block_q = min(seq_q, 128)
    # TODO(synk): pad ragged seq_q instead of requiring divisibility.
    assert seq_q % block_q == 0, "seq_q must be divisible by block_q"

    scale = 1.0 / math.sqrt(d_k)

    def per_head_in(w, b, s):
        # (out, in) -> (in, out), split out-features per head -> (heads, d_model, d_k)
        w_t = (w.T * s).reshape(d_model, heads, d_k).transpose(1, 0, 2)
        b_h = (b * s).reshape(heads, 1, d_k)
        return w_t.astype(compute_dtype), b_h.astype(jnp.float32)

    wq_h, bq_h = per_head_in(params["wq"], params["bq"], scale)   # scale folded into q proj
    wk_h, bk_h = per_head_in(params["wk"], params["bk"], 1.0)
    wv_h, bv_h = per_head_in(params["wv"], params["bv"], 1.0)
    # output projection, split in-features (concat axis) per head -> (heads, d_k, d_model)
    wo_h = params["wo"].T.reshape(heads, d_k, d_model).astype(compute_dtype)
    bo = params["bo"].reshape(1, d_model).astype(jnp.float32)

    n_q = seq_q // block_q
    grid = (bs, n_q, heads)

    q_spec = pl.BlockSpec((1, block_q, d_model), lambda b, i, h: (b, i, 0))
    kv_spec = pl.BlockSpec((1, seq_k, d_model), lambda b, i, h: (b, 0, 0))
    w_in_spec = pl.BlockSpec((1, d_model, d_k), lambda b, i, h: (h, 0, 0))
    b_in_spec = pl.BlockSpec((1, 1, d_k), lambda b, i, h: (h, 0, 0))
    wo_spec = pl.BlockSpec((1, d_k, d_model), lambda b, i, h: (h, 0, 0))
    bo_spec = pl.BlockSpec((1, d_model), lambda b, i, h: (0, 0))

    out_spec = pl.BlockSpec((1, block_q, d_model), lambda b, i, h: (b, i, 0))
    sc_spec = pl.BlockSpec((1, 1, block_q, seq_k), lambda b, i, h: (b, h, i, 0))

    # Explicit VMEM budget (double-buffered blocks + f32 accumulator) so scaled-up
    # tiles still respect v7x's 64 MiB; generous slack, clamped to sane bounds.
    def nbytes(shape, dt):
        return math.prod(shape) * jnp.dtype(dt).itemsize

    blk_bytes = (nbytes((block_q, d_model), q.dtype)
                 + 2 * nbytes((seq_k, d_model), k.dtype)
                 + 3 * nbytes((d_model, d_k), compute_dtype)
                 + 3 * nbytes((1, d_k), jnp.float32)
                 + nbytes((d_k, d_model), compute_dtype)
                 + nbytes((1, d_model), jnp.float32)
                 + nbytes((block_q, d_model), q.dtype)
                 + nbytes((block_q, seq_k), scores_dtype))
    vmem_limit = int(min(max(4 * blk_bytes
                             + nbytes((block_q, d_model), jnp.float32)
                             + (4 << 20), 16 << 20), 128 << 20))

    kernel = functools.partial(_mha_kernel, compute_dtype=compute_dtype)

    out, scores = pl.pallas_call(
        kernel,
        grid=grid,
        in_specs=[q_spec, kv_spec, kv_spec,
                  w_in_spec, b_in_spec,     # wq, bq (scaled)
                  w_in_spec, b_in_spec,     # wk, bk
                  w_in_spec, b_in_spec,     # wv, bv
                  wo_spec, bo_spec],        # wo, bo
        out_specs=[out_spec, sc_spec],
        out_shape=[jax.ShapeDtypeStruct((bs, seq_q, d_model), q.dtype),
                   jax.ShapeDtypeStruct((bs, heads, seq_q, seq_k), scores_dtype)],
        scratch_shapes=[pltpu.VMEM((block_q, d_model), jnp.float32)],
        compiler_params=pltpu.CompilerParams(
            dimension_semantics=("parallel", "parallel", "arbitrary"),
            vmem_limit_bytes=vmem_limit),
    )(q, k, v, wq_h, bq_h, wk_h, bk_h, wv_h, bv_h, wo_h, bo)
    return out, scores


def _reference(q, k, v, params, heads):
    """Pure-JAX reference mirroring the PyTorch forward (eval mode, mask=None)."""
    bs, _, d_model = q.shape
    d_k = d_model // heads

    def lin(x, w, b):
        return x @ w.T + b

    qp = lin(q, params["wq"], params["bq"]).reshape(bs, -1, heads, d_k).transpose(0, 2, 1, 3)
    kp = lin(k, params["wk"], params["bk"]).reshape(bs, -1, heads, d_k).transpose(0, 2, 1, 3)
    vp = lin(v, params["wv"], params["bv"]).reshape(bs, -1, heads, d_k).transpose(0, 2, 1, 3)

    scores = (qp @ kp.transpose(0, 1, 3, 2)) / math.sqrt(d_k)
    attn = jax.nn.softmax(scores, axis=-1)
    out_h = attn @ vp                                       # (bs, h, seq, d_k)
    concat = out_h.transpose(0, 2, 1, 3).reshape(bs, -1, d_model)
    out = lin(concat, params["wo"], params["bo"])
    return out, attn


if __name__ == "__main__":
    # Small deterministic configuration.
    bs, seq, d_model, heads = 2, 8, 32, 4

    key = jax.random.PRNGKey(0)
    ks = jax.random.split(key, 12)

    q = jax.random.normal(ks[0], (bs, seq, d_model), dtype=jnp.float32)
    k = jax.random.normal(ks[1], (bs, seq, d_model), dtype=jnp.float32)
    v = jax.random.normal(ks[2], (bs, seq, d_model), dtype=jnp.float32)

    def init_linear(kw, kb, fan_in, fan_out):
        bound = 1.0 / math.sqrt(fan_in)
        w = jax.random.uniform(kw, (fan_out, fan_in), jnp.float32, -bound, bound)
        b = jax.random.uniform(kb, (fan_out,), jnp.float32, -bound, bound)
        return w, b

    wq, bq = init_linear(ks[3], ks[4], d_model, d_model)
    wk, bk = init_linear(ks[5], ks[6], d_model, d_model)
    wv, bv = init_linear(ks[7], ks[8], d_model, d_model)
    wo, bo = init_linear(ks[9], ks[10], d_model, d_model)

    params = dict(wq=wq, bq=bq, wk=wk, bk=bk, wv=wv, bv=bv, wo=wo, bo=bo)

    out, scores = multi_head_attention(q, k, v, params, heads)
    out = jax.block_until_ready(out)
    scores = jax.block_until_ready(scores)

    out_ref, scores_ref = _reference(q, k, v, params, heads)
    assert out.shape == (bs, seq, d_model)
    assert scores.shape == (bs, heads, seq, seq)
    # Tolerance covers the EUP approximate-reciprocal softmax normalization.
    assert jnp.allclose(out, out_ref, atol=2e-3, rtol=2e-3)
    assert jnp.allclose(scores, scores_ref, atol=2e-3, rtol=2e-3)

    print("KERNEL_OK")
</pallas_src>

<mosaic_0001>
module attributes {stable_mosaic.version = 11 : i64} {
  func.func @_mha_kernel(%arg0: i32, %arg1: i32, %arg2: i32, %arg3: memref<1x8x32xf32, #tpu.memory_space<vmem>>, %arg4: memref<1x8x32xf32, #tpu.memory_space<vmem>>, %arg5: memref<1x8x32xf32, #tpu.memory_space<vmem>>, %arg6: memref<1x32x8xf32, #tpu.memory_space<vmem>>, %arg7: memref<1x1x8xf32, #tpu.memory_space<vmem>>, %arg8: memref<1x32x8xf32, #tpu.memory_space<vmem>>, %arg9: memref<1x1x8xf32, #tpu.memory_space<vmem>>, %arg10: memref<1x32x8xf32, #tpu.memory_space<vmem>>, %arg11: memref<1x1x8xf32, #tpu.memory_space<vmem>>, %arg12: memref<1x8x32xf32, #tpu.memory_space<vmem>>, %arg13: memref<1x32xf32, #tpu.memory_space<vmem>>, %arg14: memref<1x8x32xf32, #tpu.memory_space<vmem>>, %arg15: memref<1x1x8x8xf32, #tpu.memory_space<vmem>>, %arg16: memref<8x32xf32, #tpu.memory_space<vmem>>) attributes {dimension_semantics = [#tpu.dimension_semantics<parallel>, #tpu.dimension_semantics<parallel>, #tpu.dimension_semantics<arbitrary>], iteration_bounds = array<i64: 2, 1, 4>, scalar_prefetch = 0 : i64, scratch_operands = 1 : i64, tpu.core_type = #tpu.core_type<tc>, window_params = [{transform_indices = @transform_0, window_bounds = array<i64: 1, 8, 32>}, {transform_indices = @transform_1, window_bounds = array<i64: 1, 8, 32>}, {transform_indices = @transform_2, window_bounds = array<i64: 1, 8, 32>}, {transform_indices = @transform_3, window_bounds = array<i64: 1, 32, 8>}, {transform_indices = @transform_4, window_bounds = array<i64: 1, 1, 8>}, {transform_indices = @transform_5, window_bounds = array<i64: 1, 32, 8>}, {transform_indices = @transform_6, window_bounds = array<i64: 1, 1, 8>}, {transform_indices = @transform_7, window_bounds = array<i64: 1, 32, 8>}, {transform_indices = @transform_8, window_bounds = array<i64: 1, 1, 8>}, {transform_indices = @transform_9, window_bounds = array<i64: 1, 8, 32>}, {pipeline_mode = #tpu.pipeline_mode<synchronous>, transform_indices = @transform_10, window_bounds = array<i64: 1, 32>}, {transform_indices = @transform_11, window_bounds = array<i64: 1, 8, 32>}, {transform_indices = @transform_12, window_bounds = array<i64: 1, 1, 8, 8>}]} {
    %c0_i32 = arith.constant 0 : i32
    %0 = arith.cmpi eq, %arg2, %c0_i32 : i32
    %1 = arith.extui %0 : i1 to i32
    %c0_i32_0 = arith.constant 0 : i32
    %2 = arith.cmpi ne, %1, %c0_i32_0 : i32
    scf.if %2 {
      %cst_46 = arith.constant 0.000000e+00 : f32
      %54 = vector.broadcast %cst_46 : f32 to vector<8x32xf32>
      %c0_47 = arith.constant 0 : index
      %c0_48 = arith.constant 0 : index
      %55 = vector.load %arg16[%c0_47, %c0_48] : memref<8x32xf32, #tpu.memory_space<vmem>>, vector<8x32xf32>
      tpu.vector_store %arg16[%c0_47, %c0_48], %54 {strides = array<i32>} : memref<8x32xf32, #tpu.memory_space<vmem>>, vector<8x32xf32>,
    } else {
    }
    %c0 = arith.constant 0 : index
    %c0_1 = arith.constant 0 : index
    %c0_2 = arith.constant 0 : index
    %3 = vector.load %arg3[%c0, %c0_1, %c0_2] : memref<1x8x32xf32, #tpu.memory_space<vmem>>, vector<1x8x32xf32>
    %4 = vector.shape_cast %3 : vector<1x8x32xf32> to vector<8x32xf32>
    %c0_3 = arith.constant 0 : index
    %c0_4 = arith.constant 0 : index
    %c0_5 = arith.constant 0 : index
    %5 = vector.load %arg4[%c0_3, %c0_4, %c0_5] : memref<1x8x32xf32, #tpu.memory_space<vmem>>, vector<1x8x32xf32>
    %6 = vector.shape_cast %5 : vector<1x8x32xf32> to vector<8x32xf32>
    %c0_6 = arith.constant 0 : index
    %c0_7 = arith.constant 0 : index
    %c0_8 = arith.constant 0 : index
    %7 = vector.load %arg5[%c0_6, %c0_7, %c0_8] : memref<1x8x32xf32, #tpu.memory_space<vmem>>, vector<1x8x32xf32>
    %8 = vector.shape_cast %7 : vector<1x8x32xf32> to vector<8x32xf32>
    %c0_9 = arith.constant 0 : index
    %c0_10 = arith.constant 0 : index
    %c0_11 = arith.constant 0 : index
    %9 = vector.load %arg6[%c0_9, %c0_10, %c0_11] : memref<1x32x8xf32, #tpu.memory_space<vmem>>, vector<1x32x8xf32>
    %10 = vector.shape_cast %9 : vector<1x32x8xf32> to vector<32x8xf32>
    %cst = arith.constant dense<0.000000e+00> : vector<8x8xf32>
    %11 = tpu.matmul %4, %10, %cst {dimension_numbers = #tpu.dot_dimension_numbers<[1], [0], [0], [1], [0, 0, 1, 1], [], []>} : vector<8x32xf32>, vector<32x8xf32>, vector<8x8xf32> -> vector<8x8xf32>
    %c0_12 = arith.constant 0 : index
    %c0_13 = arith.constant 0 : index
    %c0_14 = arith.constant 0 : index
    %12 = vector.load %arg7[%c0_12, %c0_13, %c0_14] : memref<1x1x8xf32, #tpu.memory_space<vmem>>, vector<1x1x8xf32>
    %13 = vector.shape_cast %12 : vector<1x1x8xf32> to vector<1x8xf32>
    %14 = vector.broadcast %13 : vector<1x8xf32> to vector<8x8xf32>
    %15 = arith.addf %11, %14 : vector<8x8xf32>
    %c0_15 = arith.constant 0 : index
    %c0_16 = arith.constant 0 : index
    %c0_17 = arith.constant 0 : index
    %16 = vector.load %arg8[%c0_15, %c0_16, %c0_17] : memref<1x32x8xf32, #tpu.memory_space<vmem>>, vector<1x32x8xf32>
    %17 = vector.shape_cast %16 : vector<1x32x8xf32> to vector<32x8xf32>
    %cst_18 = arith.constant dense<0.000000e+00> : vector<8x8xf32>
    %18 = tpu.matmul %6, %17, %cst_18 {dimension_numbers = #tpu.dot_dimension_numbers<[1], [0], [0], [1], [0, 0, 1, 1], [], []>} : vector<8x32xf32>, vector<32x8xf32>, vector<8x8xf32> -> vector<8x8xf32>
    %c0_19 = arith.constant 0 : index
    %c0_20 = arith.constant 0 : index
    %c0_21 = arith.constant 0 : index
    %19 = vector.load %arg9[%c0_19, %c0_20, %c0_21] : memref<1x1x8xf32, #tpu.memory_space<vmem>>, vector<1x1x8xf32>
    %20 = vector.shape_cast %19 : vector<1x1x8xf32> to vector<1x8xf32>
    %21 = vector.broadcast %20 : vector<1x8xf32> to vector<8x8xf32>
    %22 = arith.addf %18, %21 : vector<8x8xf32>
    %c0_22 = arith.constant 0 : index
    %c0_23 = arith.constant 0 : index
    %c0_24 = arith.constant 0 : index
    %23 = vector.load %arg10[%c0_22, %c0_23, %c0_24] : memref<1x32x8xf32, #tpu.memory_space<vmem>>, vector<1x32x8xf32>
    %24 = vector.shape_cast %23 : vector<1x32x8xf32> to vector<32x8xf32>
    %cst_25 = arith.constant dense<0.000000e+00> : vector<8x8xf32>
    %25 = tpu.matmul %8, %24, %cst_25 {dimension_numbers = #tpu.dot_dimension_numbers<[1], [0], [0], [1], [0, 0, 1, 1], [], []>} : vector<8x32xf32>, vector<32x8xf32>, vector<8x8xf32> -> vector<8x8xf32>
    %c0_26 = arith.constant 0 : index
    %c0_27 = arith.constant 0 : index
    %c0_28 = arith.constant 0 : index
    %26 = vector.load %arg11[%c0_26, %c0_27, %c0_28] : memref<1x1x8xf32, #tpu.memory_space<vmem>>, vector<1x1x8xf32>
    %27 = vector.shape_cast %26 : vector<1x1x8xf32> to vector<1x8xf32>
    %28 = vector.broadcast %27 : vector<1x8xf32> to vector<8x8xf32>
    %29 = arith.addf %25, %28 : vector<8x8xf32>
    %cst_29 = arith.constant dense<0.000000e+00> : vector<8x8xf32>
    %30 = tpu.matmul %15, %22, %cst_29 {dimension_numbers = #tpu.dot_dimension_numbers<[1], [1], [0], [0], [0, 0, 1, 0], [], []>} : vector<8x8xf32>, vector<8x8xf32>, vector<8x8xf32> -> vector<8x8xf32>
    %cst_30 = arith.constant dense<0xFF800000> : vector<8xf32>
    %31 = vector.multi_reduction <maximumf>, %30, %cst_30 [1] : vector<8x8xf32> to vector<8xf32>
    %32 = vector.shape_cast %31 : vector<8xf32> to vector<8x1xf32>
    %33 = vector.broadcast %32 : vector<8x1xf32> to vector<8x8xf32>
    %34 = arith.subf %30, %33 : vector<8x8xf32>
    %35 = math.exp %34 : vector<8x8xf32>
    %cst_31 = arith.constant dense<0.000000e+00> : vector<8xf32>
    %36 = vector.multi_reduction <add>, %35, %cst_31 [1] : vector<8x8xf32> to vector<8xf32>
    %37 = vector.shape_cast %36 : vector<8xf32> to vector<8x1xf32>
    %38 = tpu.reciprocal %37 {approx = true} : vector<8x1xf32> -> vector<8x1xf32>
    %39 = vector.broadcast %38 : vector<8x1xf32> to vector<8x8xf32>
    %40 = arith.mulf %35, %39 : vector<8x8xf32>
    %c0_32 = arith.constant 0 : index
    %c0_33 = arith.constant 0 : index
    %c0_34 = arith.constant 0 : index
    %c0_35 = arith.constant 0 : index
    %41 = vector.load %arg15[%c0_32, %c0_33, %c0_34, %c0_35] : memref<1x1x8x8xf32, #tpu.memory_space<vmem>>, vector<1x1x8x8xf32>
    %42 = vector.shape_cast %41 : vector<1x1x8x8xf32> to vector<8x8xf32>
    %43 = vector.shape_cast %40 : vector<8x8xf32> to vector<1x1x8x8xf32>
    tpu.vector_store %arg15[%c0_32, %c0_33, %c0_34, %c0_35], %43 {strides = array<i32>} : memref<1x1x8x8xf32, #tpu.memory_space<vmem>>, vector<1x1x8x8xf32>,
    %cst_36 = arith.constant dense<0.000000e+00> : vector<8x8xf32>
    %44 = tpu.matmul %40, %29, %cst_36 {dimension_numbers = #tpu.dot_dimension_numbers<[1], [0], [0], [1], [0, 0, 1, 1], [], []>} : vector<8x8xf32>, vector<8x8xf32>, vector<8x8xf32> -> vector<8x8xf32>
    %c0_37 = arith.constant 0 : index
    %c0_38 = arith.constant 0 : index
    %45 = vector.load %arg16[%c0_37, %c0_38] : memref<8x32xf32, #tpu.memory_space<vmem>>, vector<8x32xf32>
    %c0_39 = arith.constant 0 : index
    %c0_40 = arith.constant 0 : index
    %c0_41 = arith.constant 0 : index
    %46 = vector.load %arg12[%c0_39, %c0_40, %c0_41] : memref<1x8x32xf32, #tpu.memory_space<vmem>>, vector<1x8x32xf32>
    %47 = vector.shape_cast %46 : vector<1x8x32xf32> to vector<8x32xf32>
    %cst_42 = arith.constant dense<0.000000e+00> : vector<8x32xf32>
    %48 = tpu.matmul %44, %47, %cst_42 {dimension_numbers = #tpu.dot_dimension_numbers<[1], [0], [0], [1], [0, 0, 1, 1], [], []>} : vector<8x8xf32>, vector<8x32xf32>, vector<8x32xf32> -> vector<8x32xf32>
    %49 = arith.addf %45, %48 : vector<8x32xf32>
    %c0_43 = arith.constant 0 : index
    %c0_44 = arith.constant 0 : index
    %50 = vector.load %arg16[%c0_43, %c0_44] : memref<8x32xf32, #tpu.memory_space<vmem>>, vector<8x32xf32>
    tpu.vector_store %arg16[%c0_43, %c0_44], %49 {strides = array<i32>} : memref<8x32xf32, #tpu.memory_space<vmem>>, vector<8x32xf32>,
    %c3_i32 = arith.constant 3 : i32
    %51 = arith.cmpi eq, %arg2, %c3_i32 : i32
    %52 = arith.extui %51 : i1 to i32
    %c0_i32_45 = arith.constant 0 : i32
    %53 = arith.cmpi ne, %52, %c0_i32_45 : i32
    scf.if %53 {
      %c0_46 = arith.constant 0 : index
      %c0_47 = arith.constant 0 : index
      %54 = vector.load %arg16[%c0_46, %c0_47] : memref<8x32xf32, #tpu.memory_space<vmem>>, vector<8x32xf32>
      %c0_48 = arith.constant 0 : index
      %c0_49 = arith.constant 0 : index
      %55 = vector.load %arg13[%c0_48, %c0_49] : memref<1x32xf32, #tpu.memory_space<vmem>>, vector<1x32xf32>
      %56 = vector.broadcast %55 : vector<1x32xf32> to vector<8x32xf32>
      %57 = arith.addf %54, %56 : vector<8x32xf32>
      %c0_50 = arith.constant 0 : index
      %c0_51 = arith.constant 0 : index
      %c0_52 = arith.constant 0 : index
      %58 = vector.load %arg14[%c0_50, %c0_51, %c0_52] : memref<1x8x32xf32, #tpu.memory_space<vmem>>, vector<1x8x32xf32>
      %59 = vector.shape_cast %58 : vector<1x8x32xf32> to vector<8x32xf32>
      %60 = vector.shape_cast %57 : vector<8x32xf32> to vector<1x8x32xf32>
      tpu.vector_store %arg14[%c0_50, %c0_51, %c0_52], %60 {strides = array<i32>} : memref<1x8x32xf32, #tpu.memory_space<vmem>>, vector<1x8x32xf32>,
    } else {
    }
    return
  }
  func.func @transform_0(%arg0: i32, %arg1: i32, %arg2: i32) -> (i32, i32, i32) {
    %c0_i32 = arith.constant 0 : i32
    %c0_i32_0 = arith.constant 0 : i32
    return %arg0, %arg1, %c0_i32 : i32, i32, i32
  }
  func.func @transform_1(%arg0: i32, %arg1: i32, %arg2: i32) -> (i32, i32, i32) {
    %c0_i32 = arith.constant 0 : i32
    %c0_i32_0 = arith.constant 0 : i32
    %c0_i32_1 = arith.constant 0 : i32
    return %arg0, %c0_i32, %c0_i32_0 : i32, i32, i32
  }
  func.func @transform_2(%arg0: i32, %arg1: i32, %arg2: i32) -> (i32, i32, i32) {
    %c0_i32 = arith.constant 0 : i32
    %c0_i32_0 = arith.constant 0 : i32
    %c0_i32_1 = arith.constant 0 : i32
    return %arg0, %c0_i32, %c0_i32_0 : i32, i32, i32
  }
  func.func @transform_3(%arg0: i32, %arg1: i32, %arg2: i32) -> (i32, i32, i32) {
    %c0_i32 = arith.constant 0 : i32
    %c0_i32_0 = arith.constant 0 : i32
    %c0_i32_1 = arith.constant 0 : i32
    return %arg2, %c0_i32, %c0_i32_0 : i32, i32, i32
  }
  func.func @transform_4(%arg0: i32, %arg1: i32, %arg2: i32) -> (i32, i32, i32) {
    %c0_i32 = arith.constant 0 : i32
    %c0_i32_0 = arith.constant 0 : i32
    %c0_i32_1 = arith.constant 0 : i32
    return %arg2, %c0_i32, %c0_i32_0 : i32, i32, i32
  }
  func.func @transform_5(%arg0: i32, %arg1: i32, %arg2: i32) -> (i32, i32, i32) {
    %c0_i32 = arith.constant 0 : i32
    %c0_i32_0 = arith.constant 0 : i32
    %c0_i32_1 = arith.constant 0 : i32
    return %arg2, %c0_i32, %c0_i32_0 : i32, i32, i32
  }
  func.func @transform_6(%arg0: i32, %arg1: i32, %arg2: i32) -> (i32, i32, i32) {
    %c0_i32 = arith.constant 0 : i32
    %c0_i32_0 = arith.constant 0 : i32
    %c0_i32_1 = arith.constant 0 : i32
    return %arg2, %c0_i32, %c0_i32_0 : i32, i32, i32
  }
  func.func @transform_7(%arg0: i32, %arg1: i32, %arg2: i32) -> (i32, i32, i32) {
    %c0_i32 = arith.constant 0 : i32
    %c0_i32_0 = arith.constant 0 : i32
    %c0_i32_1 = arith.constant 0 : i32
    return %arg2, %c0_i32, %c0_i32_0 : i32, i32, i32
  }
  func.func @transform_8(%arg0: i32, %arg1: i32, %arg2: i32) -> (i32, i32, i32) {
    %c0_i32 = arith.constant 0 : i32
    %c0_i32_0 = arith.constant 0 : i32
    %c0_i32_1 = arith.constant 0 : i32
    return %arg2, %c0_i32, %c0_i32_0 : i32, i32, i32
  }
  func.func @transform_9(%arg0: i32, %arg1: i32, %arg2: i32) -> (i32, i32, i32) {
    %c0_i32 = arith.constant 0 : i32
    %c0_i32_0 = arith.constant 0 : i32
    %c0_i32_1 = arith.constant 0 : i32
    return %arg2, %c0_i32, %c0_i32_0 : i32, i32, i32
  }
  func.func @transform_10(%arg0: i32, %arg1: i32, %arg2: i32) -> (i32, i32) {
    %c0_i32 = arith.constant 0 : i32
    %c0_i32_0 = arith.constant 0 : i32
    %c0_i32_1 = arith.constant 0 : i32
    return %c0_i32, %c0_i32_0 : i32, i32
  }
  func.func @transform_11(%arg0: i32, %arg1: i32, %arg2: i32) -> (i32, i32, i32) {
    %c0_i32 = arith.constant 0 : i32
    %c0_i32_0 = arith.constant 0 : i32
    return %arg0, %arg1, %c0_i32 : i32, i32, i32
  }
  func.func @transform_12(%arg0: i32, %arg1: i32, %arg2: i32) -> (i32, i32, i32, i32) {
    %c0_i32 = arith.constant 0 : i32
    %c0_i32_0 = arith.constant 0 : i32
    return %arg0, %arg2, %arg1, %c0_i32 : i32, i32, i32, i32
  }
}

</mosaic_0001>

<bundles_post_ra>
// kernel: tpu_custom_call.1
= control target key start
LH: loop header
LB: loop body
LE: loop exit
PB: predicated region body
PF: predicated region fallthrough
CT: control target
= control target key end

     0   :  { %s2140_s0 = inlined_call_operand.vmem [shape: f32[2,8,32], index: 0, kind: input, shape index: {}]   ;;  %s2141_s1 = inlined_call_operand.vmem [shape: f32[2,8,32], index: 1, kind: input, shape index: {}]   ;;  %s2142_s2 = inlined_call_operand.vmem [shape: f32[2,8,32], index: 2, kind: input, shape index: {}]   ;;  %s2143_s3 = inlined_call_operand.vmem [shape: f32[4,32,8], index: 3, kind: input, shape index: {}]   ;;  %s2144_s4 = inlined_call_operand.vmem [shape: f32[4,1,8], index: 4, kind: input, shape index: {}]   ;;  %s2145_s5 = inlined_call_operand.vmem [shape: f32[4,32,8], index: 5, kind: input, shape index: {}]   ;;  %s2146_s6 = inlined_call_operand.vmem [shape: f32[4,1,8], index: 6, kind: input, shape index: {}]   ;;  %s2147_s7 = inlined_call_operand.vmem [shape: f32[4,32,8], index: 7, kind: input, shape index: {}]   ;;  %s2148_s8 = inlined_call_operand.vmem [shape: f32[4,1,8], index: 8, kind: input, shape index: {}]   ;;  %s2149_s9 = inlined_call_operand.vmem [shape: f32[4,8,32], index: 9, kind: input, shape index: {}]   ;;  %s2150_s10 = inlined_call_operand.vmem [shape: f32[1,32], index: 10, kind: input, shape index: {}]   ;;  %s2151_s11 = inlined_call_operand.hbm [shape: f32[2,8,32], index: 11, kind: output, shape index: {0}]   ;;  %s2152_s12 = inlined_call_operand.hbm [shape: f32[2,4,8,8], index: 12, kind: output, shape index: {1}]  }
   0x1   :  { %2177 = sst [smem:[#allocation27_spill]] %s2143_s3 }
   0x2   :  { %2178 = sst [smem:[#allocation28_spill]] %s2145_s5 }
   0x3   :  { %2179 = sst [smem:[#allocation29_spill]] %s2149_s9 }
   0x4   :  { %2180 = sst [smem:[#allocation30_spill]] %s2150_s10 }
   0x5   :  { %2181 = sst [smem:[#allocation31_spill]] %s2151_s11 }
   0x6   :  { %2182 = sst [smem:[#allocation32_spill]] %s2152_s12 }
   0x7   :  { %18 = vsyncpa [#allocation4], 0 }
   0x8   :  { %20 = vsyncpa [#allocation4 + $0x1], 0 }
   0x9   :  { %21 = vsyncpa [#allocation6], 0 }
   0xa   :  { %23 = vsyncpa [#allocation6 + $0x1], 0  ;;  %s1805_s21 = smov 0   ;;  %s1807_s22 = smov 0  }
   0xb   :  { %s1809_s23 = smov 0   ;;  %s1811_s24 = smov 0  }
   0xc   :  { %s1813_s25 = smov 0   ;;  %s1815_s26 = smov 0  }
   0xd   :  { %s1817_s27 = smov 0   ;;  %s1819_s28 = smov 0  }
   0xe   :  { %s1821_s29 = smov 0   ;;  %s1823_s30 = smov 0  }
   0xf   :  { %s1825_s13 = smov 0  }
  0x10 LB: > { %2183 = sst [smem:[#allocation9_spill]] %s1693_s21  ;;  %s1371_s14 = sadd.s32 4294967295, %s1733_s13   ;;  %s1733_s13 = sphi %s1825_s13, %s29_s13   ;;  %s1729_s30 = sphi %s1823_s30, %s2241_s30   ;;  %s1725_s29 = sphi %s1821_s29, %s2240_s29   ;;  %s1721_s28 = sphi %s1819_s28, %s2239_s28   ;;  %s1717_s27 = sphi %s1817_s27, %s2238_s27   ;;  %s1713_s26 = sphi %s1815_s26, %s2237_s26   ;;  %s1709_s25 = sphi %s1813_s25, %s2236_s25   ;;  %s1705_s24 = sphi %s1811_s24, %s2235_s24   ;;  %s1701_s23 = sphi %s1809_s23, %s2234_s23   ;;  %s1697_s22 = sphi %s1807_s22, %s2233_s22   ;;  %s1693_s21 = sphi %s1805_s21, %s2232_s21  }
  0x11   : > { %2184 = sst [smem:[#allocation10_spill]] %s1697_s22  ;;  %s1372_s15 = sadd.s32 4294967294, %s1733_s13  }
  0x12   : > { %2185 = sst [smem:[#allocation11_spill]] %s1701_s23  ;;  %s41_s16 = sadd.s32 1, %s1725_s29 }
  0x13   : > { %2186 = sst [smem:[#allocation12_spill]] %s1705_s24  ;;  %s48_s17 = sadd.s32 1, %s1729_s30 }
  0x14   : > { %2187 = sst [smem:[#allocation13_spill]] %s1709_s25  ;;  %p42_p0 = scmp.ge.s32.totalorder %s41_s16, 4 }
  0x15   : > { %2188 = sst [smem:[#allocation14_spill]] %s1713_s26  ;;  %s340_s18 = sadd.s32 1, %s1713_s26 }
  0x16   : > { %2189 = sst [smem:[#allocation15_spill]] %s1721_s28  ;;  %p350_p1 = scmp.ne.s32.totalorder %s1713_s26, %s1709_s25 }
  0x17   : > { %2190 = sst [smem:[#allocation16_spill]] %s1725_s29  ;;  %p1867_p2 = scmp.eq.s32.totalorder %s1371_s14, 7 }
  0x18   : > { %2191 = sst [smem:[#allocation17_spill]] %s1729_s30  ;;  %s2243_s16 = smov (%p42_p0, %s41_s16), 0 }
  0x19   : > { %2192 = sst [smem:[#allocation18_spill]] %s1733_s13  ;;  %s2245_s17 = smov (!%p42_p0, %s48_s17), %s1729_s30 }
  0x1a   : > { %2194 = sst [smem:[#allocation19_spill]] %s2243_s16  ;;  %p1876_p3 = por %p1867_p2, %p350_p1 }
  0x1b   : > { %p356_p4 = scmp.ne.s32.totalorder %s1709_s25, %s1705_s24  ;;  %p50_p5 = scmp.ge.s32.totalorder %s2245_s17, 2 }
  0x1c   : > { %s2195_s20 = scalar_select %p1876_p3, 1, 0 }
  0x1d   : > { %p1882_p6 = scmp.eq.s32.totalorder %s1372_s15, 7  ;;  %s364_s12 = ssub.s32 %s1725_s29, %s2243_s16 }
  0x1e   : > { %2196 = sst [smem:[#allocation20_spill]] %s2195_s20  ;;  %s370_s11 = sadd.s32 1, %s1701_s23 }
  0x1f   : > { %s2247_s17 = smov (%p50_p5, %s2245_s17), 0  ;;  %p1893_p7 = por %p1882_p6, %p356_p4 }
  0x20   : > { %2198 = sst [smem:[#allocation21_spill]] %s2247_s17  ;;  %p380_p8 = scmp.ne.s32.totalorder %s1701_s23, %s1697_s22 }
  0x21   : > { %s2199_s10 = scalar_select %p1893_p7, 1, 0 }
  0x22   : > { %s335_s24 = ssub.s32 %s1729_s30, %s2247_s17  ;;  %p386_p9 = scmp.ne.s32.totalorder %s1697_s22, %s1693_s21 }
  0x23   : > { %2200 = sst [smem:[#allocation22_spill]] %s2199_s10  ;;  %p338_p10 = scmp.eq.s32.totalorder %s335_s24, 0 }
  0x24   : > { %s365_s15 = sor.u32 %s364_s12, %s335_s24  ;;  %p1905_p12 = por %p380_p8, %p1867_p2 }
  0x25   : > { %p368_p11 = scmp.eq.s32.totalorder %s365_s15, 0  ;;  %p1917_p13 = por %p386_p9, %p1882_p6 }
  0x26   : > { %s2201_s20 = scalar_select %p1905_p12, 1, 0 }
  0x27   : > { %s1910_s16 = scalar_select %p338_p10, %s1713_s26, %s340_s18  }
  0x28   : > { %2202 = sst [smem:[#allocation23_spill]] %s2201_s20  ;;  %p1375_p0 = scmp.ge.s32.totalorder %s1733_s13, 1 }
  0x29   : > { %2203 = sst [smem:[#allocation24_spill]] %s1910_s16  ;;  %p481_p1 = scmp.lt.s32.totalorder %s1733_s13, 9 }
  0x2a   : > { %s1913_s29 = scalar_select %p368_p11, %s1701_s23, %s370_s11  }
  0x2b   : > { %s2205_s9 = scalar_select %p1917_p13, 1, 0 }
  0x2c   : > { %2204 = sst [smem:[#allocation25_spill]] %s1913_s29  ;;  %p482_p4 = pnand %p1375_p0, %p481_p1 }
  0x2d   : > { %2206 = sst [smem:[#allocation26_spill]] %s2205_s9  ;;  %s2160_s12 = sand.u32 (!%p482_p4), 1, %s1709_s25  }
  0x2e   : > { %485 = sbr.rel (%p482_p4) target bundleno = 1226 (0x4ca), region = 64  ;;  %s2162_s11 = sand.u32 (!%p482_p4), 1, %s1697_s22  }
  0x2f   : > { %s1927_s24 = sshll.u32 (!%p482_p4), %s2160_s12, 3  ;;  %s1931_s18 = sshll.u32 (!%p482_p4), %s2162_s11, 3 }
  0x30   : > { %p566_p2 = scmp.lt.s32.totalorder (!%p482_p4), %s1721_s28, 1  ;;  %p581_p5 = scmp.lt.s32.totalorder (!%p482_p4), %s1717_s27, 3 }
  0x31   : > { %s2207_s3 = sld [smem:[#allocation27_spill]] (!%p482_p4)  ;;  %s558_s12 = scalar_lea.vmem (!%p482_p4), [#allocation3], %s1927_s24 }
  0x32   : > { %s2208_s5 = sld [smem:[#allocation28_spill]] (!%p482_p4)  ;;  %p1388_p6 = scmp.ne.s32.totalorder (!%p482_p4), %s1717_s27, 0 }
  0x33   : > { %s567_s19 = scalar_select %p566_p2, %s1721_s28, 1 }
  0x34   : > { %s1937_s14 = scalar_select %p581_p5, %s1717_s27, 3 }
  0x35   : > { %s1939_s15 = sshll.u32 %s567_s19, 3  ;;  %s2209_s28 = sld [smem:[#allocation29_spill]] }
  0x36   : > { %s1408_s21 = sshll.u32 %s1937_s14, 5  ;;  %s596_s23 = scalar_lea.vmem %s2146_s6, %s1937_s14 }
  0x37   : > { %s1957_s19 = scalar_lea.vmem %s2207_s3, %s1408_s21  ;;  %s1975_s26 = scalar_lea.vmem %s2147_s7, %s1408_s21 }
  0x38   : > { %s1966_s25 = scalar_lea.vmem %s2208_s5, %s1408_s21  ;;  %s604_s3 = scalar_lea.vmem %s2148_s8, %s1937_s14 }
  0x39   : > { %s1387_s22 = sshll.u32 %s1937_s14, 3  ;;  %s565_s5 = scalar_lea.vmem [#allocation5], %s1931_s18 }
  0x3a   : > { %612 = sbr.rel (%p1388_p6) target bundleno = 65 (0x41), region = 68 }
  0x3b   : > { %s1985_s11 = scalar_lea.vmem %s2209_s28, %s1387_s22 }
  0x3f   : > { %vm613_vm0 = vcmask 261120   ;;  %v1735_v0 = vmov 0.0  }
  0x40   : > { %614 = vst.msk [vmem:[#allocation2] sm:$0xff] %vm613_vm0, %v1735_v0 }
  0x41 PF: > { %v706_v1 = vld [vmem:[%s1966_s25 + $0x18] sm:$0xff]  ;;  %v1736_v3 = vmov 0.0   ;;  %v705_v4 = vld [vmem:[%s1966_s25 + $0x10] sm:$0xff]  ;;  %v704_v6 = vld [vmem:[%s1966_s25 + $0x8] sm:$0xff]  ;;  %s2210_s28 = scalar_lea.vmem %s2141_s1, %s1939_s15  ;;  %vm629_vm1 = vcmask 261120   ;;  %vm1737_vm2 = vmmov 0   ;;  %s2212_s13 = scalar_lea.vmem %s2144_s4, %s1937_s14 }
  0x42   : > { %v621_v2 = vld [vmem:[%s1957_s19 + $0x18] sm:$0xff]  ;;  %1443 = vmatprep.subr.mxu1 %v1736_v3  ;;  %1432 = vmatprep.subr.mxu0 %v1736_v3  ;;  %v620_v5 = vld [vmem:[%s1957_s19 + $0x10] sm:$0xff]  ;;  %v619_v7 = vld [vmem:[%s1957_s19 + $0x8] sm:$0xff]  ;;  %vm871_vm3 = vcmask 64512   ;;  %s2213_s20 = scalar_lea.vmem %s2142_s2, %s1939_s15  ;;  %p1399_p8 = scmp.ne.s32.totalorder %s1717_s27, 3 }
  0x43   : > { %1444 = vmatpush3.msra.mxu1 %v706_v1  ;;  %1433 = vmatpush3.msra.mxu0 %v621_v2  ;;  %v703_v8 = vld [vmem:[%s1966_s25] sm:$0xff]  ;;  %s2211_s25 = scalar_lea.vmem %s2140_s0, %s1939_s15  ;;  %v790_v20 = vld [vmem:[%s1975_s26 + $0x18] sm:$0xff]  ;;  %v789_v21 = vld [vmem:[%s1975_s26 + $0x10] sm:$0xff] }
  0x44   : > { %1445 = vmatprep.subr.mxu1 %v1736_v3  ;;  %1434 = vmatprep.subr.mxu0 %v1736_v3  ;;  %v616_v9 = vld [vmem:[%s2210_s28] sm:$0xff]  ;;  %v788_v22 = vld [vmem:[%s1975_s26 + $0x8] sm:$0xff] }
  0x45   : > { %1446 = vmatpush3.msra.mxu1 %v705_v4  ;;  %1435 = vmatpush3.msra.mxu0 %v620_v5  ;;  %v618_v10 = vld [vmem:[%s1957_s19] sm:$0xff] }
  0x46   : > { %1447 = vmatprep.subr.mxu1 %v1736_v3  ;;  %1436 = vmatprep.subr.mxu0 %v1736_v3  ;;  %v615_v11 = vld [vmem:[%s2211_s25] sm:$0xff] }
  0x47   : > { %1448 = vmatpush3.msra.mxu1 %v704_v6  ;;  %1437 = vmatpush3.msra.mxu0 %v619_v7  ;;  %v1391_v12 = vld [vmem:[%s596_s23] ss:$0 sm:$0xff] }
  0x48   : > { %1449 = vmatprep.subr.mxu1 %v1736_v3  ;;  %1451 = vmatprep.mubr.msk.f32.mxu1 %vm1737_vm2, %v1736_v3  ;;  %v1389_v14 = vld [vmem:[%s2212_s13] ss:$0 sm:$0xff] }
  0x49   : > { %1450 = vmatpush3.msra.mxu1 %v703_v8  ;;  %1438 = vmatprep.subr.mxu0 %v1736_v3  ;;  %v787_v23 = vld [vmem:[%s1975_s26] sm:$0xff] }
  0x4a   : > { %1452 = vmatmul.mubr.msk.f32.vlgmr.msra.gmra.mxu1 %vm629_vm1, %v616_v9  ;;  %1439 = vmatpush3.msra.mxu0 %v618_v10  ;;  %v617_v24 = vld [vmem:[%s2213_s20] sm:$0xff] }
  0x4b   : > { %1440 = vmatprep.mubr.msk.f32.mxu0 %vm1737_vm2, %v1736_v3  ;;  %1465 = vmatprep.subr.mxu1 %v1736_v3  ;;  %v1393_v33 = vld [vmem:[%s604_s3] ss:$0 sm:$0xff] }
  0x4c   : > { %1441 = vmatmul.mubr.msk.f32.vlgmr.msra.gmra.mxu0 %vm629_vm1, %v615_v11  ;;  %1467 = vmatprep.mubr.msk.f32.mxu1 %vm1737_vm2, %v1736_v3  ;;  %v1034_v37 = vld [vmem:[%s1985_s11] sm:$0xff]  ;;  %s2214_s11 = sld [smem:[#allocation30_spill]] (!%p1399_p8) }
  0x4d   : > { %1454 = vmatprep.subr.mxu0 %v1736_v3  ;;  %1462 = vmatprep.mubr.msk.f32.mxu0 %vm1737_vm2, %v1736_v3  ;;  %v1033_v43 = vld [vmem:[#allocation2] sm:$0xff] }
  0x4e   : > { %1455 = vmatpush3.msra.mxu0 %v790_v20 }
  0x4f   : > { %1456 = vmatprep.subr.mxu0 %v1736_v3 }
  0x50   : > { %1457 = vmatpush3.msra.mxu0 %v789_v21 }
  0x51   : > { %1458 = vmatprep.subr.mxu0 %v1736_v3 }
  0x52   : > { %1459 = vmatpush3.msra.mxu0 %v788_v22 }
  0x53   : > { %1460 = vmatprep.subr.mxu0 %v1736_v3 }
  0x54   : > { %1461 = vmatpush3.msra.mxu0 %v787_v23 }
  0x55   : > { %1463 = vmatmul.mubr.msk.f32.vlgmr.msra.gmra.mxu0 %vm629_vm1, %v617_v24  ;;  %1475 = vmatprep.subr.mxu0 %v1736_v3 }
  0x56   : > { %1477 = vmatprep.mubr.msk.f32.mxu0 %vm1737_vm2, %v1736_v3  ;;  %1476 = vmatpush3.msra.mxu0 %v1034_v37 }
 0x10a   : > { %v783_v13 = vpop.f32.mrf.mxu1 }
 0x10b   : > { %v784_v15 = vadd.f32 %v1391_v12, %v783_v13 }
 0x10c   : > { %v699_v16 = vpop.f32.mrf.mxu0  ;;  %v1453_v17 = vpop.f32.mrf.mxu1 }
 0x10d   : > { %v700_v18 = vadd.f32 %v1389_v14, %v699_v16  ;;  %1466 = vmatpush3.xpose.msk.msra.mxu1 %vm871_vm3, %v784_v15 }
 0x10e   : > { %v1442_v19 = vpop.f32.mrf.mxu0  ;;  %1470 = vmatprep.subr.mxu1 %v1736_v3 }
 0x110   : > { %1468 = vmatmul.mubr.msk.f32.vlgmr.msra.gmra.mxu1 %vm871_vm3, %v700_v18 }
 0x111   : > { %1472 = vmatprep.mubr.msk.f32.mxu1 %vm1737_vm2, %v1736_v3 }
 0x115   : > { %v867_v34 = vpop.f32.mrf.mxu0 }
 0x116   : > { %v868_v35 = vadd.f32 %v1393_v33, %v867_v34 }
 0x117   : > { %v1464_v36 = vpop.f32.mrf.mxu0 }
 0x118   : > { %1471 = vmatpush3.msra.mxu1 %v868_v35 }
 0x1d0   : > { %v944_v25 = vpop.f32.mrf.mxu1 }
 0x1d1   : > { %v948_v26 = vsel %vm871_vm3, %v944_v25, -inf }
 0x1d2   : > { %949 = vmax.xlane.f32.xlu0 %v948_v26  ;;  %v1469_v27 = vpop.f32.mrf.mxu1 }
 0x25b   : > { %v950_v28 = vpop.xlane.xlu0 %949 }
 0x25c   : > { %v951_v29 = vsub.f32 %v944_v25, %v950_v28 }
 0x25e   : > { %v952_v30 = vmul.f32 1.442695, %v951_v29 }
 0x260   : > { %1583 = vpow2.f32 %v952_v30 }
 0x26d   : > { %v1584_v31 = vpop.eup %1583 }
 0x26e   : > { %v954_v32 = vsel %vm871_vm3, %v1584_v31, 0.0 }
 0x26f   : > { %955 = vadd.xlane.f32.xlu0 %v954_v32 }
 0x2f8   : > { %v956_v38 = vpop.xlane.xlu0 %955 }
 0x2f9   : > { %1585 = vrcp.f32 %v956_v38 }
 0x306   : > { %v1586_v39 = vpop.eup %1585 }
 0x307   : > { %v958_v40 = vmul.f32 %v1586_v39, %v1584_v31 }
 0x309   : > { %959 = vst.msk [vmem:[%s565_s5] sm:$0xff] %vm871_vm3, %v958_v40  ;;  %1473 = vmatmul.mubr.msk.f32.vlgmr.msra.gmra.mxu1 %vm871_vm3, %v958_v40 }
 0x3c9   : > { %v1029_v41 = vpop.f32.mrf.mxu1 }
 0x3ca   : > { %1478 = vmatmul.mubr.msk.f32.vlgmr.msra.gmra.mxu0 %vm871_vm3, %v1029_v41 }
 0x3cb   : > { %v1474_v42 = vpop.f32.mrf.mxu1 }
 0x489   : > { %1113 = sbr.rel (%p1399_p8) target bundleno = 1176 (0x498), region = 72 }
 0x48a   : > { %v1104_v44 = vpop.f32.mrf.mxu0 }
 0x48b   : > { %v1108_v45 = vadd.f32 %v1104_v44, %v1033_v43 }
 0x48c   : > { %v1479_v46 = vpop.f32.mrf.mxu0 }
 0x48d   : > { %1109 = vst.msk [vmem:[#allocation2] sm:$0xff] %vm629_vm1, %v1108_v45 }
 0x48e   : > { %v1400_v48 = vld [vmem:[%s2214_s11] ss:$0 sm:$0xff] }
 0x494   : > { %v1114_v47 = vld [vmem:[#allocation2] sm:$0xff] }
 0x495   : > { %v1122_v49 = vadd.f32 %v1400_v48, %v1114_v47 }
 0x497   : > { %1123 = vst.msk [vmem:[%s558_s12] sm:$0xff] %vm629_vm1, %v1122_v49 }
 0x498 PF: > { %s2215_s9 = sld [smem:[#allocation15_spill]]  ;;  %s1144_s29 = sshll.u32 %s558_s12, 4  ;;  %s1145_s29 = int_to_ptr.vmem [resolvable:$true] %s1144_s29 }
 0x499   : > { %s2216_s21 = sld [smem:[#allocation13_spill]]  ;;  %s1587_s23 = scalar_lea.vmem %s1145_s29, 128 }
 0x49a   : > { %s2218_s19 = sld [smem:[#allocation31_spill]]  ;;  %p1588_p9 = scmp.ne.s32.totalorder %s1145_s29, %s1587_s23 }
 0x49b   : > { %s1738_s22 = smov [#allocation3]  }
 0x49c   : > { %p1589_p10 = pnand %p1588_p9, %p1876_p3  ;;  %s1591_s20 = sshll.u32 %s1738_s22, 4  ;;  %s1592_s20 = int_to_ptr.vmem [resolvable:$false] %s1591_s20 }
 0x49d   : > { %s1593_s26 = scalar_lea.vmem %s1592_s20, 256  ;;  %p1594_p0 = scmp.lt.s32.totalorder %s1145_s29, %s1592_s20 }
 0x49e   : > { %s1403_s17 = sshll.u32 %s2215_s9, 7  ;;  %p1590_p11 = pneg %p1589_p10 }
 0x49f   : > { %s2219_s10 = sand.u32 1, %s2216_s21   ;;  %p1595_p1 = scmp.lt.s32.totalorder %s1593_s26, %s1587_s23 }
 0x4a0   : > { %s1142_s16 = scalar_lea.hbm %s2218_s19, %s1403_s17  ;;  %s1125_s13 = scalar_lea.sflag [#allocation4], %s2219_s10 }
 0x4a1   : > { %p1596_p4 = por %p1595_p1, %p1594_p0 }
 0x4a3   : > { %p1597_p2 = pnand %p1596_p4, %p1590_p11 }
 0x4a5   : > { %1600 = shalt.err (!%p1597_p2)
}
 0x4a6   : > { %s1601_s15 = scalar_lea.hbm %s1142_s16, 128  ;;  %s1605_s3 = scalar_lea.hbm %s2218_s19, 256 }
 0x4a7   : > { %p1602_p5 = scmp.ne.s32.totalorder %s1142_s16, %s1601_s15  ;;  %p1606_p9 = scmp.lt.s32.totalorder %s1142_s16, %s2218_s19 }
 0x4a8   : > { %p1607_p10 = scmp.lt.s32.totalorder %s1605_s3, %s1601_s15 }
 0x4a9   : > { %p1603_p6 = pnand %p1602_p5, %p1876_p3 }
 0x4aa   : > { %p1608_p13 = por %p1607_p10, %p1606_p9 }
 0x4ab   : > { %p1604_p8 = pneg %p1603_p6 }
 0x4ad   : > { %p1609_p7 = pnand %p1608_p13, %p1604_p8 }
 0x4af   : > { %1612 = shalt.err (!%p1609_p7)
}
 0x4b0   : > { %s2220_s21 = sld [smem:[#allocation10_spill]]  ;;  %s1404_s30 = sshll.u32 %s2215_s9, 2 }
 0x4b1   : > { %1480 = dma.vmem_to_hbm [thread:$0]  (%p1876_p3), %s1145_s29, 128, %s1142_s16, %s1125_s13  }
 0x4b2   : > { %s1160_s25 = sshll.u32 %s565_s5, 4  ;;  %s1156_s10 = sadd.s32 %s1717_s27, %s1404_s30  ;;  %s1161_s25 = int_to_ptr.vmem [resolvable:$true] %s1160_s25 }
 0x4b3   : > { %s1405_s23 = sshll.u32 %s1156_s10, 7  ;;  %s2222_s26 = sld [smem:[#allocation32_spill]] }
 0x4b4   : > { %s1613_s14 = scalar_lea.vmem %s1161_s25, 128  ;;  %s1739_s28 = smov [#allocation5]  }
 0x4b5   : > { %p1614_p7 = scmp.ne.s32.totalorder %s1161_s25, %s1613_s14  ;;  %s1617_s11 = sshll.u32 %s1739_s28, 4  ;;  %s1618_s11 = int_to_ptr.vmem [resolvable:$false] %s1617_s11 }
 0x4b6   : > { %s2224_s12 = sand.u32 1, %s2220_s21   ;;  %s1619_s9 = scalar_lea.vmem %s1618_s11, 256 }
 0x4b7   : > { %s1130_s3 = scalar_lea.sflag [#allocation6], %s2224_s12  ;;  %p1615_p13 = pnand %p1614_p7, %p1905_p12 }
 0x4b8   : > { %p1620_p3 = scmp.lt.s32.totalorder %s1161_s25, %s1618_s11  ;;  %p1621_p0 = scmp.lt.s32.totalorder %s1619_s9, %s1613_s14 }
 0x4b9   : > { %s2223_s15 = smov %s2222_s26  ;;  %s1158_s24 = scalar_lea.hbm %s2222_s26, %s1405_s23 }
 0x4ba   : > { %p1616_p11 = pneg %p1615_p13  ;;  %p1622_p1 = por %p1621_p0, %p1620_p3 }
 0x4bc   : > { %p1623_p4 = pnand %p1622_p1, %p1616_p11 }
 0x4be   : > { %1626 = shalt.err (!%p1623_p4)
}
 0x4bf   : > { %s1627_s5 = scalar_lea.hbm %s1158_s24, 128  ;;  %s1631_s16 = scalar_lea.hbm %s2223_s15, 1024 }
 0x4c0   : > { %p1628_p2 = scmp.ne.s32.totalorder %s1158_s24, %s1627_s5  ;;  %p1632_p8 = scmp.lt.s32.totalorder %s1158_s24, %s2223_s15 }
 0x4c1   : > { %p1633_p9 = scmp.lt.s32.totalorder %s1631_s16, %s1627_s5 }
 0x4c2   : > { %p1629_p5 = pnand %p1628_p2, %p1905_p12 }
 0x4c3   : > { %p1634_p10 = por %p1633_p9, %p1632_p8 }
 0x4c4   : > { %p1630_p6 = pneg %p1629_p5 }
 0x4c6   : > { %p1635_p7 = pnand %p1634_p10, %p1630_p6 }
 0x4c8   : > { %1638 = shalt.err (!%p1635_p7)
}
 0x4c9   : > { %1481 = dma.vmem_to_hbm [thread:$0]  (%p1905_p12), %s1161_s25, 128, %s1158_s24, %s1130_s3  }
 0x4ca PF: > { %s2225_s21 = sld [smem:[#allocation18_spill]] }
 0x4cb   : > { %s2226_s30 = sld [smem:[#allocation12_spill]] }
 0x4cc   : > { %s2227_s10 = sld [smem:[#allocation22_spill]] }
 0x4d0   : > { %p1491_p13 = scmp.ge.s32.totalorder %s2225_s21, 2 }
 0x4d1   : > { %s1172_s23 = sand.u32 1, %s2226_s30  }
 0x4d2   : > { %p2228_p11 = scmp.ne.s32.totalorder %s2227_s10, 0  ;;  %s1173_s22 = scalar_lea.sflag [#allocation4], %s1172_s23 }
 0x4d4   : > { %p1485_p3 = pnand %p1491_p13, %p2228_p11 }
 0x4d6   : > { %p1486_p0 = pneg %p1485_p3 }
 0x4d8   : > { %1684 = dma.done.wait (%p1486_p0), %s1173_s22, 128  }
 0x4d9   : > { %1686 = vsyncadd (%p1486_p0), %s1173_s22, 4294967168  ;;  %s2229_s20 = sld [smem:[#allocation9_spill]] }
 0x4da   : > { %s2230_s26 = sld [smem:[#allocation26_spill]] }
 0x4df   : > { %s1181_s12 = sand.u32 1, %s2229_s20  }
 0x4e0   : > { %p2231_p1 = scmp.ne.s32.totalorder %s2230_s26, 0  ;;  %s1182_s17 = scalar_lea.sflag [#allocation6], %s1181_s12 }
 0x4e2   : > { %p1488_p4 = pnand %p1491_p13, %p2231_p1 }
 0x4e4   : > { %p1489_p2 = pneg %p1488_p4 }
 0x4e6   : > { %1688 = dma.done.wait (%p1489_p2), %s1182_s17, 128  }
 0x4e7   : > { %1690 = vsyncadd (%p1489_p2), %s1182_s17, 4294967168  ;;  %s29_s13 = sadd.s32 1, %s2225_s21   ;;  %s2232_s21 = sld [smem:[#allocation10_spill]] }
 0x4e8   : > { %p26_p12 = scmp.ge.s32.totalorder %s29_s13, 10   ;;  %s2233_s22 = sld [smem:[#allocation11_spill]] }
 0x4e9   : > { %s2234_s23 = sld [smem:[#allocation25_spill]] }
 0x4ea   : > { %s2235_s24 = sld [smem:[#allocation13_spill]] }
 0x4eb   : > { %s2236_s25 = sld [smem:[#allocation14_spill]] }
 0x4ec   : > { %s2237_s26 = sld [smem:[#allocation24_spill]]  ;;  %28 = sbr.rel (!%p26_p12) target bundleno = 16 (0x10), region = 151 }
 0x4ed   : > { %s2238_s27 = sld [smem:[#allocation16_spill]] }
 0x4ee   : > { %s2239_s28 = sld [smem:[#allocation17_spill]] }
 0x4ef   : > { %s2240_s29 = sld [smem:[#allocation19_spill]] }
 0x4f0   : > { %s2241_s30 = sld [smem:[#allocation21_spill]] }
 0x4f1   :  { %1187 = vsyncpa [#allocation4], 1 }
 0x4f2   :  { %1189 = vsyncpa [#allocation4 + $0x1], 1 }
 0x4f3   :  { %1190 = vsyncpa [#allocation6], 1 }
 0x4f4   :  { %1192 = vsyncpa [#allocation6 + $0x1], 1 }

</bundles_post_ra>
